<compile_context>
chip_gen: v5e
topology: v5e:2x2
jax: 0.10.0
libtpu: 0.0.40
codegen_flags: <defaults>
</compile_context>

<pallas_src>
import jax
import jax.numpy as jnp
from jax.experimental import pallas as pl
from jax.experimental.pallas import tpu as pltpu


_TARGET_BLOCK_BYTES = 8 * 1024 * 1024    # ~8 MiB of x per block
_LANE_CAP_BYTES = 16 * 1024              # 16 KiB of lanes per row (4096 f32 / 8192 bf16)
_VMEM_LIMIT_BYTES = 48 * 1024 * 1024     # < 64 MiB v7x physical; > v5e/v6e scoped defaults


def _add_bias_kernel(x_ref, b_ref, o_ref):
    # x_ref: (TR, TL) lane-dense tile, b_ref: (TR, 1) per-row bias -> lane splat on VPU.
    o_ref[...] = x_ref[...] + b_ref[...]


def _row_granule(itemsize: int) -> int:
    # Second-minor (sublane) tiling granule: 8 for f32, 16 for bf16, 32 for int8/fp8.
    return max(8, 32 // itemsize)


def _pick_lane_block(L: int, cap: int) -> int:
    """Full L if it fits; else prefer a 128-multiple divisor of L (full-width edge blocks)."""
    if L <= cap:
        return L
    cap128 = max(128, (cap // 128) * 128)
    t = cap128
    while t >= max(128, cap128 // 2):
        if L % t == 0:
            return t
        t -= 128
    return cap128


def _pick_row_block(R: int, cap: int, granule: int) -> int:
    """Full R if it fits; else the largest granule-multiple <= cap."""
    if R <= cap:
        return R
    return max(granule, (cap // granule) * granule)


def learnable_bias(x: jax.Array, bias: jax.Array) -> jax.Array:
    """out = x + bias.expand_as(x); x: (N, C, H, W), bias: (1, C, 1, 1)."""
    N, C, H, W = x.shape
    assert bias.shape == (1, C, 1, 1), bias.shape
    dtype = x.dtype
    itemsize = jnp.dtype(dtype).itemsize

    R = N * C          # row (sublane) extent: one row per (batch, channel)
    L = H * W          # lane extent: spatial positions, contiguous in NCHW

    # Free metadata reshape (row-major contiguous) -> lane-dense 2D view.
    x2 = x.reshape(R, L)
    # Dense per-row bias: row n*C + c = bias[c], matching the NCHW flattening. Tiny.
    # TODO(synk): bias is cast to x.dtype; PyTorch mixed-precision promotion (f32 bias +
    # bf16 x) would compute the add in f32 — negligible for a bias add.
    b2 = jnp.tile(bias.astype(dtype).reshape(C, 1), (N, 1))

    # Byte-targeted block sizing (~8 MiB of x per block).
    granule = _row_granule(itemsize)
    TL = _pick_lane_block(L, _LANE_CAP_BYTES // itemsize)
    TR = _pick_row_block(R, max(granule, _TARGET_BLOCK_BYTES // (TL * itemsize)), granule)

    # v7x megacore: ensure >=2 grid steps along a parallel axis so both TCs get work
    # (no-op on single-TC v5e/v6e). Prefer splitting the row axis.
    if pl.cdiv(R, TR) * pl.cdiv(L, TL) == 1:
        if R >= 2 * granule:
            TR = max(granule, ((R // 2) // granule) * granule)
        elif L >= 256:
            TL = max(128, ((L // 2) // 128) * 128)

    grid = (pl.cdiv(R, TR), pl.cdiv(L, TL))  # rows outermost: bias DMA skipped on inner steps

    out2 = pl.pallas_call(
        _add_bias_kernel,
        out_shape=jax.ShapeDtypeStruct((R, L), dtype),
        grid_spec=pltpu.PrefetchScalarGridSpec(
            num_scalar_prefetch=0,
            grid=grid,
            in_specs=[
                pl.BlockSpec((TR, TL), lambda r, c: (r, c)),
                pl.BlockSpec((TR, 1), lambda r, c: (r, 0)),
            ],
            out_specs=pl.BlockSpec((TR, TL), lambda r, c: (r, c)),
        ),
        compiler_params=pltpu.CompilerParams(
            dimension_semantics=("parallel", "parallel"),
            vmem_limit_bytes=_VMEM_LIMIT_BYTES,
        ),
        input_output_aliases={0: 0},   # donate the activation buffer (out aliases x2)
        cost_estimate=pl.CostEstimate(
            flops=R * L,
            transcendentals=0,
            bytes_accessed=2 * R * L * itemsize + R * itemsize,
        ),
    )(x2, b2)

    return out2.reshape(N, C, H, W)


if __name__ == "__main__":
    # Small shapes consistent with an NCHW conv feature map.
    N, C, H, W = 2, 4, 16, 16

    key = jax.random.PRNGKey(0)
    kx, _ = jax.random.split(key)
    x = jax.random.normal(kx, (N, C, H, W), dtype=jnp.float32)

    # nn.Parameter(torch.zeros(...)) initializes to zero; also exercise a nonzero
    # bias so the per-channel broadcast path is actually tested.
    bias = (jnp.arange(C, dtype=jnp.float32) * 0.1 - 0.15).reshape(1, C, 1, 1)
    bias_zero = jnp.zeros((1, C, 1, 1), dtype=jnp.float32)

    out = jax.block_until_ready(learnable_bias(x, bias))
    out_zero = jax.block_until_ready(learnable_bias(x, bias_zero))

    # Reference check against plain JAX broadcasting.
    ref = x + jnp.broadcast_to(bias, x.shape)
    assert out.shape == x.shape and out.dtype == x.dtype
    assert jnp.allclose(out, ref, atol=1e-6), "mismatch vs reference"
    assert jnp.allclose(out_zero, x, atol=0.0), "zero-bias must be identity"

    print("KERNEL_OK")
</pallas_src>

<mosaic_0001>
module attributes {stable_mosaic.version = 11 : i64} {
  func.func @_add_bias_kernel(%arg0: i32, %arg1: i32, %arg2: memref<8x128xf32, #tpu.memory_space<vmem>>, %arg3: memref<8x1xf32, #tpu.memory_space<vmem>>, %arg4: memref<8x128xf32, #tpu.memory_space<vmem>>) attributes {dimension_semantics = [#tpu.dimension_semantics<parallel>, #tpu.dimension_semantics<parallel>], iteration_bounds = array<i64: 1, 2>, scalar_prefetch = 0 : i64, scratch_operands = 0 : i64, tpu.core_type = #tpu.core_type<tc>, window_params = [{transform_indices = @transform_0, window_bounds = array<i64: 8, 128>}, {transform_indices = @transform_1, window_bounds = array<i64: 8, 1>}, {transform_indices = @transform_2, window_bounds = array<i64: 8, 128>}]} {
    %c0 = arith.constant 0 : index
    %c0_0 = arith.constant 0 : index
    %0 = vector.load %arg2[%c0, %c0_0] : memref<8x128xf32, #tpu.memory_space<vmem>>, vector<8x128xf32>
    %c0_1 = arith.constant 0 : index
    %c0_2 = arith.constant 0 : index
    %1 = vector.load %arg3[%c0_1, %c0_2] : memref<8x1xf32, #tpu.memory_space<vmem>>, vector<8x1xf32>
    %2 = vector.broadcast %1 : vector<8x1xf32> to vector<8x128xf32>
    %3 = arith.addf %0, %2 : vector<8x128xf32>
    %c0_3 = arith.constant 0 : index
    %c0_4 = arith.constant 0 : index
    %4 = vector.load %arg4[%c0_3, %c0_4] : memref<8x128xf32, #tpu.memory_space<vmem>>, vector<8x128xf32>
    tpu.vector_store %arg4[%c0_3, %c0_4], %3 {strides = array<i32>} : memref<8x128xf32, #tpu.memory_space<vmem>>, vector<8x128xf32>,
    return
  }
  func.func @transform_0(%arg0: i32, %arg1: i32) -> (i32, i32) {
    %c0_i32 = arith.constant 0 : i32
    return %arg0, %arg1 : i32, i32
  }
  func.func @transform_1(%arg0: i32, %arg1: i32) -> (i32, i32) {
    %c0_i32 = arith.constant 0 : i32
    %c0_i32_0 = arith.constant 0 : i32
    return %arg0, %c0_i32 : i32, i32
  }
  func.func @transform_2(%arg0: i32, %arg1: i32) -> (i32, i32) {
    %c0_i32 = arith.constant 0 : i32
    return %arg0, %arg1 : i32, i32
  }
}

</mosaic_0001>

<bundles_post_ra>
// kernel: tpu_custom_call.1
= control target key start
LH: loop header
LB: loop body
LE: loop exit
PB: predicated region body
PF: predicated region fallthrough
CT: control target
= control target key end

     0   :  { %7 = vsyncpa [#allocation3], 0  ;;  %s651_s0 = inlined_call_operand.hbm [shape: f32[8,256], index: 0, kind: input, shape index: {}, may-alias: {0,2}]   ;;  %s652_s1 = inlined_call_operand.vmem [shape: f32[8,1], index: 1, kind: input, shape index: {}]   ;;  %s653_s2 = inlined_call_operand.hbm [shape: f32[8,256], index: 2, kind: output, shape index: {}, may-alias: {0,2}]  }
   0x1   :  { %9 = vsyncpa [#allocation3 + $0x1], 0 }
   0x2   :  { %10 = vsyncpa [#allocation4], 0 }
   0x3   :  { %12 = vsyncpa [#allocation4 + $0x1], 0  ;;  %s528_s9 = smov 0   ;;  %s530_s10 = smov 0  }
   0x4   :  { %s532_s11 = smov 0   ;;  %s534_s12 = smov 0  }
   0x5   :  { %s536_s13 = smov 0   ;;  %s538_s14 = smov 0  }
   0x6 LB: > { %s320_s15 = sadd.s32 4294967295, %s510_s14   ;;  %s321_s16 = sadd.s32 4294967294, %s510_s14   ;;  %s510_s14 = sphi %s538_s14, %s18_s14   ;;  %s506_s13 = sphi %s536_s13, %s662_s13   ;;  %s502_s12 = sphi %s534_s12, %s661_s12   ;;  %s498_s11 = sphi %s532_s11, %s660_s11   ;;  %s494_s10 = sphi %s530_s10, %s659_s10   ;;  %s490_s9 = sphi %s528_s9, %s658_s9  }
   0x7   : > { %s27_s17 = sadd.s32 1, %s506_s13  ;;  %s39_s18 = sadd.s32 1, %s498_s11 }
   0x8   : > { %p28_p0 = scmp.ge.s32.totalorder %s27_s17, 2  ;;  %p46_p1 = scmp.ne.s32.totalorder %s498_s11, %s494_s10 }
   0x9   : > { %p47_p2 = scmp.eq.s32.totalorder %s510_s14, 0  ;;  %p52_p3 = scmp.ne.s32.totalorder %s494_s10, %s490_s9 }
   0xa   : > { %s664_s17 = smov (%p28_p0, %s27_s17), 0  ;;  %p53_p5 = scmp.eq.s32.totalorder %s320_s15, 0 }
   0xb   : > { %p569_p4 = por %p47_p2, %p46_p1  ;;  %s35_s20 = ssub.s32 %s506_s13, %s664_s17 }
   0xc   : > { %p104_p6 = scmp.eq.s32.totalorder %s320_s15, 1  ;;  %p37_p7 = scmp.eq.s32.totalorder %s35_s20, 0 }
   0xd   : > { %p575_p8 = por %p53_p5, %p52_p3  ;;  %p110_p10 = scmp.eq.s32.totalorder %s321_s16, 1 }
   0xe   : > { %p579_p9 = por %p104_p6, %p46_p1  ;;  %p324_p12 = scmp.ge.s32.totalorder %s510_s14, 2 }
   0xf   : > { %s584_s23 = scalar_select %p37_p7, %s498_s11, %s39_s18  }
  0x10   : > { %p586_p11 = por %p110_p10, %p52_p3  ;;  %p346_p13 = scmp.lt.s32.totalorder %s510_s14, 2 }
  0x11   : > { %s137_s25 = sand.u32 1, %s498_s11   ;;  %s326_s27 = sshll.u32 %s506_s13, 3 }
  0x12   : > { %s325_s26 = sshll.u32 %s137_s25, 3  ;;  %s147_s30 = scalar_lea.hbm %s651_s0, %s326_s27 }
  0x13   : > { %s141_s3 = scalar_lea.vmem [#allocation2], %s325_s26  ;;  %s149_s5 = sshll.u32 %s147_s30, 4  ;;  %s150_s5 = int_to_ptr.hbm [resolvable:$true] %s149_s5 }
  0x14   : > { %s151_s4 = sshll.u32 %s141_s3, 4  ;;  %p339_p0 = pnand %p346_p13, %p569_p4  ;;  %s152_s4 = int_to_ptr.vmem [resolvable:$true] %s151_s4 }
  0x15   : > { %p327_p1 = scmp.ge.s32.totalorder %s510_s14, 1  ;;  %p156_p2 = scmp.lt.s32.totalorder %s510_s14, 3 }
  0x16   : > { %s138_s6 = scalar_lea.sflag [#allocation3], %s137_s25 }
  0x17   : > { %341 = dma.hbm_to_vmem [thread:$0]  (!%p339_p0), %s150_s5, 128, %s152_s4, %s138_s6  }
  0x18   : > { %p157_p3 = pnand %p327_p1, %p156_p2 }
  0x19   : > { %s602_s7 = sand.u32 (!%p157_p3), 1, %s494_s10  }
  0x1a   : > { %160 = sbr.rel (%p157_p3) target bundleno = 154 (0x9a), region = 28  ;;  %s328_s8 = sshll.u32 (!%p157_p3), %s602_s7, 3 }
  0x1b   : > { %s163_s15 = scalar_lea.sflag (!%p157_p3), [#allocation3], %s602_s7  ;;  %s166_s16 = scalar_lea.vmem (!%p157_p3), [#allocation2], %s328_s8 }
  0x1f   : > { %481 = dma.done.wait (%p575_p8), %s163_s15, 128  }
  0x20   : > { %483 = vsyncadd (%p575_p8), %s163_s15, 4294967168  ;;  %v512_v0 = vmov 0   ;;  %v197_v1 = vld [vmem:[%s652_s1] sm:$0xff]  ;;  %s331_s20 = sshll.u32 %s502_s12, 3  ;;  %s191_s28 = scalar_lea.vmem [#allocation5], %s328_s8 }
  0x21   : > { %397 = vset.pattern.permute.xlu0 %v512_v0  ;;  %s218_s27 = scalar_lea.hbm %s653_s2, %s331_s20  ;;  %v196_v2 = vld [vmem:[%s166_s16] sm:$0xff]  ;;  %s220_s29 = sshll.u32 %s191_s28, 4  ;;  %s221_s29 = int_to_ptr.vmem [resolvable:$true] %s220_s29 }
  0x22   : > { %200 = vperm.xlu0 %397, %v197_v1   ;;  %s222_s21 = sshll.u32 %s218_s27, 4  ;;  %s206_s30 = scalar_lea.sflag [#allocation4], %s602_s7  ;;  %s223_s21 = int_to_ptr.hbm [resolvable:$true] %s222_s21 }
  0x23   : > { %s442_s3 = sshra.s32 %s223_s21, 4  ;;  %s448_s6 = scalar_lea.hbm %s653_s2, 16  ;;  %s443_s3 = int_to_ptr.hbm [resolvable:$true] %s442_s3 }
  0x24   : > { %s444_s4 = scalar_lea.hbm %s443_s3, 8  ;;  %p449_p7 = scmp.lt.s32.totalorder %s443_s3, %s653_s2 }
  0x25   : > { %p445_p4 = scmp.ne.s32.totalorder %s443_s3, %s444_s4  ;;  %p450_p8 = scmp.lt.s32.totalorder %s448_s6, %s444_s4 }
  0x27   : > { %p446_p5 = pnand %p445_p4, %p579_p9  ;;  %p451_p10 = por %p450_p8, %p449_p7 }
  0x29   : > { %p447_p6 = pneg %p446_p5 }
  0x2b   : > { %p452_p13 = pnand %p451_p10, %p447_p6 }
  0x94   : > { %v201_v3 = vpop.permute.xlu0 %200 }
  0x95   : > { %v203_v4 = vadd.f32 %v201_v3, %v196_v2 }
  0x97   : > { %204 = vst [vmem:[%s191_s28] sm:$0xff] %v203_v4 }
  0x98   : > { %455 = shalt.err (!%p452_p13)
}
  0x99   : > { %336 = dma.vmem_to_hbm [thread:$0]  (%p579_p9), %s221_s29, 128, %s223_s21, %s206_s30  }
  0x9a PF: > { %s234_s7 = sand.u32 1, %s490_s9   ;;  %p343_p0 = pnand %p324_p12, %p586_p11 }
  0x9b   : > { %s235_s16 = scalar_lea.sflag [#allocation4], %s234_s7 }
  0x9c   : > { %p344_p1 = pneg %p343_p0 }
  0x9e   : > { %485 = dma.done.wait (%p344_p1), %s235_s16, 128  }
  0x9f   : > { %487 = vsyncadd (%p344_p1), %s235_s16, 4294967168  ;;  %s18_s14 = sadd.s32 1, %s510_s14   ;;  %s658_s9 = smov %s494_s10 }
  0xa0   : > { %p15_p2 = scmp.ge.s32.totalorder %s18_s14, 4   ;;  %s659_s10 = smov %s498_s11 }
  0xa1   : > { %s660_s11 = smov %s584_s23  ;;  %s661_s12 = smov %s506_s13 }
  0xa2   : > { %s662_s13 = smov %s664_s17  ;;  %17 = sbr.rel (!%p15_p2) target bundleno = 6 (0x6), region = 76 }
  0xa7   :  { %241 = vsyncpa [#allocation3], 1 }
  0xa8   :  { %243 = vsyncpa [#allocation3 + $0x1], 1 }
  0xa9   :  { %244 = vsyncpa [#allocation4], 1 }
  0xaa   :  { %246 = vsyncpa [#allocation4 + $0x1], 1 }

</bundles_post_ra>
